<compile_context>
chip_gen: v5e
topology: v5e:2x2
jax: 0.10.0
libtpu: 0.0.40
codegen_flags: <defaults>
</compile_context>

<pallas_src>
import jax
import jax.numpy as jnp
from jax.experimental import pallas as pl
from jax.experimental.pallas import tpu as pltpu


def _round_up(x, m):
    return ((x + m - 1) // m) * m


def pinn_kernel(xT_ref, w1T_ref, b1T_ref, w2T_ref, b2T_ref, w3_ref, b3_ref, o_ref):
    """Whole MLP for one batch tile, entirely in VMEM.  Batch is on the lane axis."""
    xT = xT_ref[...]           # (3, tn)   rows = (x, y, t), batch on lanes
    w1T = w1T_ref[...]         # (64, 3)

    # Layer 1 (in=3): three broadcast FMAs on the VPU — K=3 badly underfills the MXU.
    z1 = (w1T[:, 0:1] * xT[0:1, :]
          + w1T[:, 1:2] * xT[1:2, :]
          + w1T[:, 2:3] * xT[2:3, :]
          + b1T_ref[...])                                          # (64, tn)
    h1 = jnp.tanh(z1)

    # Layer 2 (64x64): dense MXU matmul, lane-dense (64, tn) output.
    z2 = jnp.dot(w2T_ref[...], h1, preferred_element_type=jnp.float32) + b2T_ref[...]
    h2 = jnp.tanh(z2)                                              # (64, tn)

    # Layer 3 (64 -> 1): VPU broadcast-multiply + sublane reduce (no M=1 matmul).
    out = jnp.sum(w3_ref[...] * h2, axis=0, keepdims=True) + b3_ref[...]   # (1, tn)
    o_ref[...] = out.astype(o_ref.dtype)


def pinn_forward(x, params, *, tile_max=2048):
    """x: (N, 3) float32; params: dict of weights/biases.  Returns (N, 1) float32."""
    w1, b1, w2, b2, w3, b3 = (
        params["w1"], params["b1"], params["w2"],
        params["b2"], params["w3"], params["b3"],
    )
    N, F = x.shape
    assert F == 3

    # Batch tile on the lane axis: multiple of 128, as large as practical
    # (for big N this keeps several grid steps so both v7x TensorCores get work).
    tn = min(tile_max, _round_up(N, 128))
    n_pad = _round_up(N, tn)
    grid = n_pad // tn

    # Lane-dense, transposed operands for the kernel (layout plumbing only).
    xT = jnp.pad(x.T, ((0, 0), (0, n_pad - N)))                    # (3, n_pad)
    w1T = w1.T                                                     # (64, 3)
    b1T = b1.reshape(64, 1)                                        # (64, 1)
    w2T = w2.T                                                     # (64, 64)
    b2T = b2.reshape(64, 1)                                        # (64, 1)
    w3c = w3.reshape(64, 1)                                        # (64, 1)
    b3c = b3.reshape(1, 1)                                         # (1, 1)

    const = lambda shape: pl.BlockSpec(shape, lambda i: (0, 0))

    flops = 2 * n_pad * (3 * 64 + 64 * 64 + 64)
    transcendentals = 128 * n_pad
    bytes_accessed = 4 * n_pad * (3 + 1) + 4 * (3 * 64 + 64 + 64 * 64 + 64 + 64 + 1)

    out = pl.pallas_call(
        pinn_kernel,
        out_shape=jax.ShapeDtypeStruct((1, n_pad), jnp.float32),
        grid_spec=pltpu.PrefetchScalarGridSpec(
            num_scalar_prefetch=0,
            grid=(grid,),
            in_specs=[
                pl.BlockSpec((3, tn), lambda i: (0, i)),   # xT tile (batch on lanes)
                const((64, 3)),                            # w1T
                const((64, 1)),                            # b1T
                const((64, 64)),                           # w2T
                const((64, 1)),                            # b2T
                const((64, 1)),                            # w3 column
                const((1, 1)),                             # b3
            ],
            out_specs=pl.BlockSpec((1, tn), lambda i: (0, i)),     # lane-dense store
        ),
        compiler_params=pltpu.CompilerParams(
            dimension_semantics=("parallel",),
        ),
        cost_estimate=pl.CostEstimate(
            flops=flops,
            transcendentals=transcendentals,
            bytes_accessed=bytes_accessed,
        ),
    )(xT, w1T, b1T, w2T, b2T, w3c, b3c)

    return out[0, :N][:, None]                                     # (N, 1)


def init_params(key):
    """Deterministic init matching PyTorch Linear default: U(-1/sqrt(fan_in), +)."""
    ks = jax.random.split(key, 6)

    def lin(kw, kb, fan_in, fan_out):
        bound = 1.0 / jnp.sqrt(fan_in)
        w = jax.random.uniform(kw, (fan_in, fan_out), jnp.float32, -bound, bound)
        b = jax.random.uniform(kb, (1, fan_out), jnp.float32, -bound, bound)
        return w, b

    w1, b1 = lin(ks[0], ks[1], 3, 64)
    w2, b2 = lin(ks[2], ks[3], 64, 64)
    w3, b3 = lin(ks[4], ks[5], 64, 1)
    return {"w1": w1, "b1": b1, "w2": w2, "b2": b2, "w3": w3, "b3": b3}


def pinn_reference(x, p):
    h1 = jnp.tanh(x @ p["w1"] + p["b1"])
    h2 = jnp.tanh(h1 @ p["w2"] + p["b2"])
    return h2 @ p["w3"] + p["b3"]


if __name__ == "__main__":
    key = jax.random.PRNGKey(0)
    k_param, k_x = jax.random.split(key)

    params = init_params(k_param)
    # Small PINN collocation batch: 128 points of (x, y, t).
    x = jax.random.uniform(k_x, (128, 3), jnp.float32)

    out = pinn_forward(x, params)
    out = jax.block_until_ready(out)

    ref = pinn_reference(x, params)
    assert out.shape == (128, 1)
    assert jnp.allclose(out, ref, atol=1e-5, rtol=1e-5)

    print("KERNEL_OK")
</pallas_src>

<mosaic_0001>
module attributes {stable_mosaic.version = 11 : i64} {
  func.func @pinn_kernel(%arg0: i32, %arg1: memref<3x128xf32, #tpu.memory_space<vmem>>, %arg2: memref<64x3xf32, #tpu.memory_space<vmem>>, %arg3: memref<64x1xf32, #tpu.memory_space<vmem>>, %arg4: memref<64x64xf32, #tpu.memory_space<vmem>>, %arg5: memref<64x1xf32, #tpu.memory_space<vmem>>, %arg6: memref<64x1xf32, #tpu.memory_space<vmem>>, %arg7: memref<1x1xf32, #tpu.memory_space<vmem>>, %arg8: memref<1x128xf32, #tpu.memory_space<vmem>>) attributes {dimension_semantics = [#tpu.dimension_semantics<parallel>], iteration_bounds = array<i64: 1>, scalar_prefetch = 0 : i64, scratch_operands = 0 : i64, tpu.core_type = #tpu.core_type<tc>, window_params = [{transform_indices = @transform_0, window_bounds = array<i64: 3, 128>}, {pipeline_mode = #tpu.pipeline_mode<synchronous>, transform_indices = @transform_1, window_bounds = array<i64: 64, 3>}, {pipeline_mode = #tpu.pipeline_mode<synchronous>, transform_indices = @transform_2, window_bounds = array<i64: 64, 1>}, {pipeline_mode = #tpu.pipeline_mode<synchronous>, transform_indices = @transform_3, window_bounds = array<i64: 64, 64>}, {pipeline_mode = #tpu.pipeline_mode<synchronous>, transform_indices = @transform_4, window_bounds = array<i64: 64, 1>}, {pipeline_mode = #tpu.pipeline_mode<synchronous>, transform_indices = @transform_5, window_bounds = array<i64: 64, 1>}, {pipeline_mode = #tpu.pipeline_mode<synchronous>, transform_indices = @transform_6, window_bounds = array<i64: 1, 1>}, {transform_indices = @transform_7, window_bounds = array<i64: 1, 128>}]} {
    %c0 = arith.constant 0 : index
    %c0_0 = arith.constant 0 : index
    %0 = vector.load %arg1[%c0, %c0_0] : memref<3x128xf32, #tpu.memory_space<vmem>>, vector<3x128xf32>
    %c0_1 = arith.constant 0 : index
    %c0_2 = arith.constant 0 : index
    %1 = vector.load %arg2[%c0_1, %c0_2] : memref<64x3xf32, #tpu.memory_space<vmem>>, vector<64x3xf32>
    %2 = vector.extract_strided_slice %1 {offsets = [0, 0], sizes = [64, 1], strides = [1, 1]} : vector<64x3xf32> to vector<64x1xf32>
    %3 = vector.extract_strided_slice %0 {offsets = [0, 0], sizes = [1, 128], strides = [1, 1]} : vector<3x128xf32> to vector<1x128xf32>
    %4 = vector.broadcast %2 : vector<64x1xf32> to vector<64x128xf32>
    %5 = vector.broadcast %3 : vector<1x128xf32> to vector<64x128xf32>
    %6 = arith.mulf %4, %5 : vector<64x128xf32>
    %7 = vector.extract_strided_slice %1 {offsets = [0, 1], sizes = [64, 1], strides = [1, 1]} : vector<64x3xf32> to vector<64x1xf32>
    %8 = vector.extract_strided_slice %0 {offsets = [1, 0], sizes = [1, 128], strides = [1, 1]} : vector<3x128xf32> to vector<1x128xf32>
    %9 = vector.broadcast %7 : vector<64x1xf32> to vector<64x128xf32>
    %10 = vector.broadcast %8 : vector<1x128xf32> to vector<64x128xf32>
    %11 = arith.mulf %9, %10 : vector<64x128xf32>
    %12 = arith.addf %6, %11 : vector<64x128xf32>
    %13 = vector.extract_strided_slice %1 {offsets = [0, 2], sizes = [64, 1], strides = [1, 1]} : vector<64x3xf32> to vector<64x1xf32>
    %14 = vector.extract_strided_slice %0 {offsets = [2, 0], sizes = [1, 128], strides = [1, 1]} : vector<3x128xf32> to vector<1x128xf32>
    %15 = vector.broadcast %13 : vector<64x1xf32> to vector<64x128xf32>
    %16 = vector.broadcast %14 : vector<1x128xf32> to vector<64x128xf32>
    %17 = arith.mulf %15, %16 : vector<64x128xf32>
    %18 = arith.addf %12, %17 : vector<64x128xf32>
    %c0_3 = arith.constant 0 : index
    %c0_4 = arith.constant 0 : index
    %19 = vector.load %arg3[%c0_3, %c0_4] : memref<64x1xf32, #tpu.memory_space<vmem>>, vector<64x1xf32>
    %20 = vector.broadcast %19 : vector<64x1xf32> to vector<64x128xf32>
    %21 = arith.addf %18, %20 : vector<64x128xf32>
    %22 = math.tanh %21 : vector<64x128xf32>
    %c0_5 = arith.constant 0 : index
    %c0_6 = arith.constant 0 : index
    %23 = vector.load %arg4[%c0_5, %c0_6] : memref<64x64xf32, #tpu.memory_space<vmem>>, vector<64x64xf32>
    %cst = arith.constant dense<0.000000e+00> : vector<64x128xf32>
    %24 = tpu.matmul %23, %22, %cst {dimension_numbers = #tpu.dot_dimension_numbers<[1], [0], [0], [1], [0, 0, 1, 1], [], []>} : vector<64x64xf32>, vector<64x128xf32>, vector<64x128xf32> -> vector<64x128xf32>
    %c0_7 = arith.constant 0 : index
    %c0_8 = arith.constant 0 : index
    %25 = vector.load %arg5[%c0_7, %c0_8] : memref<64x1xf32, #tpu.memory_space<vmem>>, vector<64x1xf32>
    %26 = vector.broadcast %25 : vector<64x1xf32> to vector<64x128xf32>
    %27 = arith.addf %24, %26 : vector<64x128xf32>
    %28 = math.tanh %27 : vector<64x128xf32>
    %c0_9 = arith.constant 0 : index
    %c0_10 = arith.constant 0 : index
    %29 = vector.load %arg6[%c0_9, %c0_10] : memref<64x1xf32, #tpu.memory_space<vmem>>, vector<64x1xf32>
    %30 = vector.broadcast %29 : vector<64x1xf32> to vector<64x128xf32>
    %31 = arith.mulf %30, %28 : vector<64x128xf32>
    %cst_11 = arith.constant dense<0.000000e+00> : vector<128xf32>
    %32 = vector.multi_reduction <add>, %31, %cst_11 [0] : vector<64x128xf32> to vector<128xf32>
    %33 = vector.shape_cast %32 : vector<128xf32> to vector<1x128xf32>
    %c0_12 = arith.constant 0 : index
    %c0_13 = arith.constant 0 : index
    %34 = vector.load %arg7[%c0_12, %c0_13] : memref<1x1xf32, #tpu.memory_space<vmem>>, vector<1x1xf32>
    %35 = vector.broadcast %34 : vector<1x1xf32> to vector<1x128xf32>
    %36 = arith.addf %33, %35 : vector<1x128xf32>
    %c0_14 = arith.constant 0 : index
    %c0_15 = arith.constant 0 : index
    %37 = vector.load %arg8[%c0_14, %c0_15] : memref<1x128xf32, #tpu.memory_space<vmem>>, vector<1x128xf32>
    tpu.vector_store %arg8[%c0_14, %c0_15], %36 {strides = array<i32>} : memref<1x128xf32, #tpu.memory_space<vmem>>, vector<1x128xf32>,
    return
  }
  func.func @transform_0(%arg0: i32) -> (i32, i32) {
    %c0_i32 = arith.constant 0 : i32
    %c0_i32_0 = arith.constant 0 : i32
    return %c0_i32, %arg0 : i32, i32
  }
  func.func @transform_1(%arg0: i32) -> (i32, i32) {
    %c0_i32 = arith.constant 0 : i32
    %c0_i32_0 = arith.constant 0 : i32
    %c0_i32_1 = arith.constant 0 : i32
    return %c0_i32, %c0_i32_0 : i32, i32
  }
  func.func @transform_2(%arg0: i32) -> (i32, i32) {
    %c0_i32 = arith.constant 0 : i32
    %c0_i32_0 = arith.constant 0 : i32
    %c0_i32_1 = arith.constant 0 : i32
    return %c0_i32, %c0_i32_0 : i32, i32
  }
  func.func @transform_3(%arg0: i32) -> (i32, i32) {
    %c0_i32 = arith.constant 0 : i32
    %c0_i32_0 = arith.constant 0 : i32
    %c0_i32_1 = arith.constant 0 : i32
    return %c0_i32, %c0_i32_0 : i32, i32
  }
  func.func @transform_4(%arg0: i32) -> (i32, i32) {
    %c0_i32 = arith.constant 0 : i32
    %c0_i32_0 = arith.constant 0 : i32
    %c0_i32_1 = arith.constant 0 : i32
    return %c0_i32, %c0_i32_0 : i32, i32
  }
  func.func @transform_5(%arg0: i32) -> (i32, i32) {
    %c0_i32 = arith.constant 0 : i32
    %c0_i32_0 = arith.constant 0 : i32
    %c0_i32_1 = arith.constant 0 : i32
    return %c0_i32, %c0_i32_0 : i32, i32
  }
  func.func @transform_6(%arg0: i32) -> (i32, i32) {
    %c0_i32 = arith.constant 0 : i32
    %c0_i32_0 = arith.constant 0 : i32
    %c0_i32_1 = arith.constant 0 : i32
    return %c0_i32, %c0_i32_0 : i32, i32
  }
  func.func @transform_7(%arg0: i32) -> (i32, i32) {
    %c0_i32 = arith.constant 0 : i32
    %c0_i32_0 = arith.constant 0 : i32
    return %c0_i32, %arg0 : i32, i32
  }
}

</mosaic_0001>

<bundles_post_ra>
// kernel: tpu_custom_call.1
= control target key start
LH: loop header
LB: loop body
LE: loop exit
PB: predicated region body
PF: predicated region fallthrough
CT: control target
= control target key end

     0   :  { %s810_s0 = inlined_call_operand.vmem [shape: f32[3,128], index: 0, kind: input, shape index: {}]   ;;  %s811_s1 = inlined_call_operand.vmem [shape: f32[64,3], index: 1, kind: input, shape index: {}]   ;;  %s812_s2 = inlined_call_operand.vmem [shape: f32[64,1], index: 2, kind: input, shape index: {}]   ;;  %s813_s3 = inlined_call_operand.vmem [shape: f32[64,64], index: 3, kind: input, shape index: {}]   ;;  %s814_s4 = inlined_call_operand.vmem [shape: f32[64,1], index: 4, kind: input, shape index: {}]   ;;  %s815_s5 = inlined_call_operand.vmem [shape: f32[64,1], index: 5, kind: input, shape index: {}]   ;;  %s816_s6 = inlined_call_operand.<no memory space> [shape: f32[1,1], index: 6, kind: input, shape index: {}]   ;;  %s817_s7 = inlined_call_operand.hbm [shape: f32[1,128], index: 7, kind: output, shape index: {}]  }
   0x1   :  { %v12_v0 = vstv %s816_s6 }
   0x2   :  { %13 = vst [vmem:[#allocation2] sm:$0x1] %v12_v0 }
   0x3   :  { %v34_v1 = vld [vmem:[%s811_s1 + $0x20] sm:$0xff]  ;;  %v32_v2 = vld [vmem:[%s811_s1 + $0x10] sm:$0xff]  ;;  %v581_v4 = vmov 0  }
   0x4   :  { %v30_v3 = vld [vmem:[%s811_s1] sm:$0xff]  ;;  %511 = vset.pattern.permute.xlu2 %v581_v4  ;;  %510 = vset.pattern.permute.xlu1 %v581_v4 }
   0x5   :  { %509 = vset.pattern.permute.xlu0 %v581_v4  ;;  %60 = vperm.xlu2 %511, %v34_v1  }
   0x6   :  { %14 = vsyncpa [#allocation4], 0  ;;  %50 = vperm.xlu1 %510, %v32_v2   ;;  %40 = vperm.xlu0 %509, %v30_v3   ;;  %v35_v5 = vld [vmem:[%s811_s1 + $0x28] sm:$0xff]  ;;  %v33_v6 = vld [vmem:[%s811_s1 + $0x18] sm:$0xff]  ;;  %v582_v10 = vmov 1   ;;  %v583_v11 = vmov 2  }
   0x7   :  { %v31_v7 = vld [vmem:[%s811_s1 + $0x8] sm:$0xff]  ;;  %v37_v8 = vld [vmem:[%s811_s1 + $0x38] sm:$0xff]  ;;  %v36_v9 = vld [vmem:[%s811_s1 + $0x30] sm:$0xff]  ;;  %vm305_vm0 = vcmask 523264  }
   0x8   :  { %v192_v12 = vld [vmem:[%s812_s2 + $0x38] sm:$0xff]  ;;  %v191_v13 = vld [vmem:[%s812_s2 + $0x30] sm:$0xff]  ;;  %v190_v14 = vld [vmem:[%s812_s2 + $0x28] sm:$0xff] }
   0x9   :  { %v189_v15 = vld [vmem:[%s812_s2 + $0x20] sm:$0xff]  ;;  %v188_v16 = vld [vmem:[%s812_s2 + $0x18] sm:$0xff]  ;;  %v187_v18 = vld [vmem:[%s812_s2 + $0x10] sm:$0xff] }
   0xa   :  { %v185_v17 = vld [vmem:[%s812_s2] sm:$0xff]  ;;  %v186_v20 = vld [vmem:[%s812_s2 + $0x8] sm:$0xff]  ;;  %v259_v25 = vld [vmem:[%s814_s4 + $0x10] sm:$0xff] }
   0xb   :  { %v261_v19 = vld [vmem:[%s814_s4 + $0x20] sm:$0xff]  ;;  %v380_v22 = vld [vmem:[%s815_s5 + $0x8] sm:$0xff]  ;;  %v264_v26 = vld [vmem:[%s814_s4 + $0x38] sm:$0xff] }
   0xc   :  { %v257_v21 = vld [vmem:[%s814_s4] sm:$0xff]  ;;  %v258_v24 = vld [vmem:[%s814_s4 + $0x8] sm:$0xff]  ;;  %v260_v28 = vld [vmem:[%s814_s4 + $0x18] sm:$0xff] }
   0xd   :  { %65 = vperm.xlu2 %511, %v35_v5   ;;  %v262_v29 = vld [vmem:[%s814_s4 + $0x28] sm:$0xff]  ;;  %v379_v31 = vld [vmem:[%s815_s5] sm:$0xff]  ;;  %v263_v35 = vld [vmem:[%s814_s4 + $0x30] sm:$0xff] }
   0xe   :  { %55 = vperm.xlu1 %510, %v33_v6   ;;  %45 = vperm.xlu0 %509, %v31_v7   ;;  %v384_v30 = vld [vmem:[%s815_s5 + $0x28] sm:$0xff]  ;;  %v29_v33 = vld [vmem:[%s810_s0] sm:$0x7]  ;;  %v381_v42 = vld [vmem:[%s815_s5 + $0x10] sm:$0xff]  ;;  %s464_s0 = sshll.u32 %s817_s7, 4  ;;  %s465_s0 = int_to_ptr.hbm [resolvable:$true] %s464_s0 }
   0xf   :  { %v713_v34 = vperm.slane %v29_v33, 1  ;;  %v718_v36 = vperm.slane %v29_v33, 0  ;;  %v448_v38 = vld [vmem:[#allocation2] sm:$0x1]  ;;  %v382_v45 = vld [vmem:[%s815_s5 + $0x18] sm:$0xff]  ;;  %v385_v50 = vld [vmem:[%s815_s5 + $0x30] sm:$0xff] }
  0x10   :  { %v383_v48 = vld [vmem:[%s815_s5 + $0x20] sm:$0xff]  ;;  %v386_v53 = vld [vmem:[%s815_s5 + $0x38] sm:$0xff]  ;;  %v745_v54 = vperm.slane %v29_v33, 2 }
  0x15   :  { %512 = vset.pattern.permute.xlu2 %v582_v10 }
  0x16   :  { %75 = vperm.xlu1 %510, %v37_v8   ;;  %70 = vperm.xlu0 %509, %v36_v9  }
  0x17   :  { %88 = vperm.xlu2 %512, %v30_v3  }
  0x1e   :  { %514 = vset.pattern.permute.xlu1 %v582_v10  ;;  %513 = vset.pattern.permute.xlu0 %v582_v10 }
  0x1f   :  { %112 = vperm.xlu1 %514, %v36_v9   ;;  %515 = vset.pattern.permute.xlu2 %v583_v11 }
  0x20   :  { %116 = vperm.xlu0 %513, %v37_v8   ;;  %165 = vperm.xlu2 %515, %v37_v8  }
  0x27   :  { %108 = vperm.xlu1 %514, %v35_v5  }
  0x28   :  { %104 = vperm.xlu0 %513, %v34_v1   ;;  %161 = vperm.xlu2 %515, %v36_v9  }
  0x2f   :  { %516 = vset.pattern.permute.xlu1 %v583_v11 }
  0x30   :  { %100 = vperm.xlu0 %513, %v33_v6   ;;  %157 = vperm.xlu1 %516, %v35_v5  }
  0x31   :  { %517 = vset.pattern.permute.xlu2 %v581_v4 }
  0x32   :  { %230 = vperm.xlu2 %517, %v192_v12  }
  0x38   :  { %96 = vperm.xlu0 %513, %v32_v2   ;;  %153 = vperm.xlu1 %516, %v34_v1  }
  0x3a   :  { %225 = vperm.xlu2 %517, %v191_v13  }
  0x40   :  { %92 = vperm.xlu0 %513, %v31_v7   ;;  %149 = vperm.xlu1 %516, %v33_v6  }
  0x42   :  { %220 = vperm.xlu2 %517, %v190_v14  }
  0x48   :  { %518 = vset.pattern.permute.xlu0 %v583_v11  ;;  %145 = vperm.xlu1 %516, %v32_v2  }
  0x49   :  { %141 = vperm.xlu0 %518, %v31_v7  }
  0x4a   :  { %215 = vperm.xlu2 %517, %v189_v15  }
  0x50   :  { %519 = vset.pattern.permute.xlu1 %v581_v4 }
  0x51   :  { %522 = vset.pattern.permute.xlu0 %v581_v4  ;;  %210 = vperm.xlu1 %519, %v188_v16  }
  0x52   :  { %520 = vset.pattern.permute.xlu2 %v583_v11  ;;  %195 = vperm.xlu0 %522, %v185_v17  }
  0x53   :  { %137 = vperm.xlu2 %520, %v30_v3  }
  0x59   :  { %205 = vperm.xlu1 %519, %v187_v18  }
  0x5a   :  { %287 = vperm.xlu0 %522, %v261_v19  }
  0x5b   :  { %521 = vset.pattern.permute.xlu2 %v581_v4 }
  0x5c   :  { %200 = vperm.xlu2 %521, %v186_v20  }
  0x5f   :  { %v685_v23 = vpop.permute.xlu2 %60 }
  0x61   :  { %267 = vperm.xlu1 %519, %v257_v21   ;;  %v83_v21 = vmul.f32 %v718_v36, %v685_v23 }
  0x62   :  { %394 = vperm.xlu0 %522, %v380_v22  }
  0x64   :  { %272 = vperm.xlu2 %521, %v258_v24  }
  0x67   :  { %v696_v27 = vpop.permute.xlu2 %65 }
  0x68   :  { %v84_v11 = vmul.f32 %v718_v36, %v696_v27 }
  0x69   :  { %277 = vperm.xlu1 %519, %v259_v25  }
  0x6a   :  { %302 = vperm.xlu0 %522, %v264_v26  }
  0x6c   :  { %282 = vperm.xlu2 %521, %v260_v28  }
  0x71   :  { %292 = vperm.xlu1 %519, %v262_v29   ;;  %v89_v32 = vpop.permute.xlu2 %88 }
  0x72   :  { %414 = vperm.xlu0 %522, %v384_v30   ;;  %v120_v37 = vmul.f32 %v713_v34, %v89_v32 }
  0x74   :  { %389 = vperm.xlu2 %521, %v379_v31  }
  0x78   :  { %v721_v39 = vpop.permute.xlu1 %50  ;;  %v41_v40 = vpop.permute.xlu0 %40 }
  0x79   :  { %v79_v41 = vmul.f32 %v718_v36, %v41_v40  ;;  %297 = vperm.xlu1 %519, %v263_v35  }
  0x7a   :  { %451 = vperm.xlu0 %522, %v448_v38   ;;  %v166_v43 = vpop.permute.xlu2 %165 }
  0x7b   :  { %v727_v44 = vadd.f32 %v120_v37, %v79_v41  ;;  %v176_v61 = vmul.f32 %v745_v54, %v166_v43 }
  0x7c   :  { %399 = vperm.xlu2 %521, %v381_v42  }
  0x80   :  { %v732_v46 = vpop.permute.xlu1 %55  ;;  %v734_v47 = vpop.permute.xlu0 %45 }
  0x81   :  { %404 = vperm.xlu1 %519, %v382_v45   ;;  %v82_v37 = vmul.f32 %v718_v36, %v732_v46  ;;  %v81_v46 = vmul.f32 %v718_v36, %v721_v39 }
  0x82   :  { %v162_v49 = vpop.permute.xlu2 %161 }
  0x83   :  { %v175_v57 = vmul.f32 %v745_v54, %v162_v49  ;;  %v80_v49 = vmul.f32 %v718_v36, %v734_v47 }
  0x84   :  { %409 = vperm.xlu2 %521, %v383_v48  }
  0x88   :  { %v76_v51 = vpop.permute.xlu1 %75  ;;  %v71_v52 = vpop.permute.xlu0 %70 }
  0x89   :  { %419 = vperm.xlu1 %519, %v385_v50   ;;  %v85_v58 = vmul.f32 %v718_v36, %v71_v52  ;;  %v86_v62 = vmul.f32 %v718_v36, %v76_v51 }
  0x8c   :  { %424 = vperm.xlu2 %521, %v386_v53   ;;  %v231_v55 = vpop.permute.xlu2 %230 }
  0x91   :  { %v113_v56 = vpop.permute.xlu1 %112 }
  0x92   :  { %v126_v59 = vmul.f32 %v713_v34, %v113_v56  ;;  %v117_v60 = vpop.permute.xlu0 %116 }
  0x93   :  { %v127_v63 = vmul.f32 %v713_v34, %v117_v60 }
  0x94   :  { %v134_v0 = vadd.f32 %v126_v59, %v85_v58  ;;  %v226_v4 = vpop.permute.xlu2 %225 }
  0x95   :  { %v135_v1 = vadd.f32 %v127_v63, %v86_v62 }
  0x96   :  { %v183_v2 = vadd.f32 %v175_v57, %v134_v0 }
  0x97   :  { %v184_v3 = vadd.f32 %v176_v61, %v135_v1 }
  0x98   :  { %v239_v6 = vadd.f32 %v226_v4, %v183_v2  ;;  %v251_v2 = vld [vmem:[%s813_s3 + $0x10] sm:$0xff] }
  0x99   :  { %v240_v5 = vadd.f32 %v231_v55, %v184_v3  ;;  %v109_v7 = vpop.permute.xlu1 %108  ;;  %v253_v3 = vld [vmem:[%s813_s3 + $0x20] sm:$0xff]  ;;  %v255_v4 = vld [vmem:[%s813_s3 + $0x30] sm:$0xff] }
  0x9a   :  { %v105_v8 = vpop.permute.xlu0 %104  ;;  %v125_v9 = vmul.f32 %v713_v34, %v109_v7  ;;  %v254_v7 = vld [vmem:[%s813_s3 + $0x28] sm:$0xff] }
  0x9b   :  { %523 = vtanh.f32 %v240_v5  ;;  %v124_v19 = vmul.f32 %v713_v34, %v105_v8  ;;  %v250_v5 = vld [vmem:[%s813_s3 + $0x8] sm:$0xff]  ;;  %v256_v8 = vld [vmem:[%s813_s3 + $0x38] sm:$0xff] }
  0x9c   :  { %525 = vtanh.f32 %v239_v6  ;;  %v133_v14 = vadd.f32 %v125_v9, %v84_v11  ;;  %v221_v17 = vpop.permute.xlu2 %220  ;;  %v252_v6 = vld [vmem:[%s813_s3 + $0x18] sm:$0xff] }
  0x9d   :  { %v132_v24 = vadd.f32 %v124_v19, %v83_v21 }
  0xa1   :  { %v524_v10 = vpop.eup %523 }
  0xa2   :  { %338 = vmatpush.msra.mxu0 %v524_v10  ;;  %481 = vmatpush.msra.mxu1 %v524_v10  ;;  %v158_v12 = vpop.permute.xlu1 %157  ;;  %v526_v13 = vpop.eup %525 }
  0xa3   :  { %v101_v15 = vpop.permute.xlu0 %100  ;;  %482 = vmatpush.msra.mxu2 %v524_v10  ;;  %483 = vmatpush.msra.mxu3 %v524_v10  ;;  %v174_v16 = vmul.f32 %v745_v54, %v158_v12 }
  0xa4   :  { %339 = vmatpush.msra.mxu0 %v526_v13  ;;  %484 = vmatpush.msra.mxu1 %v526_v13  ;;  %v216_v28 = vpop.permute.xlu2 %215  ;;  %v123_v35 = vmul.f32 %v713_v34, %v101_v15 }
  0xa5   :  { %v182_v18 = vadd.f32 %v174_v16, %v133_v14  ;;  %485 = vmatpush.msra.mxu2 %v526_v13  ;;  %486 = vmatpush.msra.mxu3 %v526_v13 }
  0xa6   :  { %v131_v40 = vadd.f32 %v123_v35, %v82_v37 }
  0xa7   :  { %v238_v20 = vadd.f32 %v221_v17, %v182_v18 }
  0xa9   :  { %527 = vtanh.f32 %v238_v20 }
  0xaa   :  { %v154_v22 = vpop.permute.xlu1 %153 }
  0xab   :  { %v173_v25 = vmul.f32 %v745_v54, %v154_v22  ;;  %v97_v26 = vpop.permute.xlu0 %96 }
  0xac   :  { %v122_v50 = vmul.f32 %v713_v34, %v97_v26 }
  0xad   :  { %v181_v27 = vadd.f32 %v173_v25, %v132_v24  ;;  %v138_v41 = vpop.permute.xlu2 %137 }
  0xae   :  { %v130_v56 = vadd.f32 %v122_v50, %v81_v46  ;;  %v169_v57 = vmul.f32 %v745_v54, %v138_v41 }
  0xaf   :  { %v528_v29 = vpop.eup %527  ;;  %v237_v30 = vadd.f32 %v216_v28, %v181_v27 }
  0xb0   :  { %340 = vmatpush.msra.mxu0 %v528_v29  ;;  %487 = vmatpush.msra.mxu1 %v528_v29  ;;  %v177_v63 = vadd.f32 %v169_v57, %v727_v44  ;;  %v249_v44 = vld [vmem:[%s813_s3] sm:$0xff]  ;;  %s584_s3 = smov [#allocation3]  }
  0xb1   :  { %529 = vtanh.f32 %v237_v30  ;;  %488 = vmatpush.msra.mxu2 %v528_v29  ;;  %489 = vmatpush.msra.mxu3 %v528_v29  ;;  %s462_s28 = sshll.u32 %s584_s3, 4  ;;  %s463_s28 = int_to_ptr.vmem [resolvable:$true] %s462_s28 }
  0xb2   :  { %v150_v31 = vpop.permute.xlu1 %149 }
  0xb3   :  { %v93_v33 = vpop.permute.xlu0 %92  ;;  %v172_v38 = vmul.f32 %v745_v54, %v150_v31 }
  0xb4   :  { %v121_v43 = vmul.f32 %v713_v34, %v93_v33 }
  0xb5   :  { %v180_v45 = vadd.f32 %v172_v38, %v131_v40 }
  0xb6   :  { %v129_v53 = vadd.f32 %v121_v43, %v80_v49  ;;  %v201_v59 = vpop.permute.xlu2 %200 }
  0xb7   :  { %v530_v32 = vpop.eup %529 }
  0xb8   :  { %341 = vmatpush.msra.mxu0 %v530_v32  ;;  %490 = vmatpush.msra.mxu1 %v530_v32 }
  0xb9   :  { %491 = vmatpush.msra.mxu2 %v530_v32  ;;  %492 = vmatpush.msra.mxu3 %v530_v32 }
  0xba   :  { %v146_v23 = vpop.permute.xlu1 %145 }
  0xbb   :  { %v142_v42 = vpop.permute.xlu0 %141  ;;  %v171_v55 = vmul.f32 %v745_v54, %v146_v23 }
  0xbc   :  { %v170_v51 = vmul.f32 %v745_v54, %v142_v42 }
  0xbd   :  { %v179_v60 = vadd.f32 %v171_v55, %v130_v56 }
  0xbe   :  { %v178_v58 = vadd.f32 %v170_v51, %v129_v53  ;;  %v273_v10 = vpop.permute.xlu2 %272 }
  0xc0   :  { %v234_v34 = vadd.f32 %v201_v59, %v178_v58 }
  0xc3   :  { %v211_v48 = vpop.permute.xlu1 %210 }
  0xc4   :  { %v236_v52 = vadd.f32 %v211_v48, %v180_v45  ;;  %v196_v61 = vpop.permute.xlu0 %195 }
  0xc5   :  { %v233_v36 = vadd.f32 %v196_v61, %v177_v63 }
  0xc6   :  { %531 = vtanh.f32 %v236_v52  ;;  %v283_v12 = vpop.permute.xlu2 %282 }
  0xcb   :  { %v206_v47 = vpop.permute.xlu1 %205 }
  0xcc   :  { %v532_v62 = vpop.eup %531  ;;  %v235_v0 = vadd.f32 %v206_v47, %v179_v60  ;;  %v288_v13 = vpop.permute.xlu0 %287 }
  0xcd   :  { %342 = vmatpush.msra.mxu0 %v532_v62  ;;  %493 = vmatpush.msra.mxu1 %v532_v62 }
  0xce   :  { %533 = vtanh.f32 %v235_v0  ;;  %494 = vmatpush.msra.mxu2 %v532_v62  ;;  %495 = vmatpush.msra.mxu3 %v532_v62  ;;  %v390_v15 = vpop.permute.xlu2 %389 }
  0xcf   :  { %535 = vtanh.f32 %v234_v34 }
  0xd0   :  { %537 = vtanh.f32 %v233_v36 }
  0xd3   :  { %v268_v9 = vpop.permute.xlu1 %267 }
  0xd4   :  { %v534_v39 = vpop.eup %533  ;;  %v395_v18 = vpop.permute.xlu0 %394 }
  0xd5   :  { %343 = vmatpush.msra.mxu0 %v534_v39  ;;  %496 = vmatpush.msra.mxu1 %v534_v39  ;;  %v536_v54 = vpop.eup %535 }
  0xd6   :  { %497 = vmatpush.msra.mxu2 %v534_v39  ;;  %498 = vmatpush.msra.mxu3 %v534_v39  ;;  %v538_v1 = vpop.eup %537  ;;  %v400_v28 = vpop.permute.xlu2 %399 }
  0xd7   :  { %344 = vmatpush.msra.mxu0 %v536_v54  ;;  %499 = vmatpush.msra.mxu1 %v536_v54 }
  0xd8   :  { %500 = vmatpush.msra.mxu2 %v536_v54  ;;  %501 = vmatpush.msra.mxu3 %v536_v54 }
  0xd9   :  { %345 = vmatpush.msra.mxu0 %v538_v1  ;;  %502 = vmatpush.msra.mxu1 %v538_v1 }
  0xda   :  { %503 = vmatpush.msra.mxu2 %v538_v1  ;;  %504 = vmatpush.msra.mxu3 %v538_v1 }
  0xdb   :  { %473 = vmatmul.msk.f32.vlgmr.msra.gmra.mxu0 %vm305_vm0, %v249_v44  ;;  %475 = vmatmul.msk.f32.vlgmr.msra.gmra.mxu1 %vm305_vm0, %v251_v2  ;;  %v278_v11 = vpop.permute.xlu1 %277 }
  0xdc   :  { %477 = vmatmul.msk.f32.vlgmr.msra.gmra.mxu2 %vm305_vm0, %v253_v3  ;;  %479 = vmatmul.msk.f32.vlgmr.msra.gmra.mxu3 %vm305_vm0, %v255_v4  ;;  %v303_v23 = vpop.permute.xlu0 %302 }
  0xde   :  { %v410_v49 = vpop.permute.xlu2 %409 }
  0xe3   :  { %474 = vmatmul.msk.f32.gmra.mxu0 %vm305_vm0, %v250_v5  ;;  %476 = vmatmul.msk.f32.gmra.mxu1 %vm305_vm0, %v252_v6  ;;  %v293_v14 = vpop.permute.xlu1 %292 }
  0xe4   :  { %478 = vmatmul.msk.f32.gmra.mxu2 %vm305_vm0, %v254_v7  ;;  %480 = vmatmul.msk.f32.gmra.mxu3 %vm305_vm0, %v256_v8  ;;  %v415_v59 = vpop.permute.xlu0 %414 }
  0xe6   :  { %v425_v0 = vpop.permute.xlu2 %424 }
  0xeb   :  { %v298_v19 = vpop.permute.xlu1 %297 }
  0xec   :  { %v452_v4 = vpop.permute.xlu0 %451 }
  0xed   :  { %v454_v6 = vperm.slane %v452_v4, 0 }
  0xf3   :  { %v405_v41 = vpop.permute.xlu1 %404 }
  0xfb   :  { %v420_v62 = vpop.permute.xlu1 %419 }
 0x158   :  { %v347_v16 = vpop.f32.mrf.mxu0  ;;  %v353_v17 = vpop.f32.mrf.mxu1 }
 0x159   :  { %v348_v20 = vadd.f32 %v347_v16, %v268_v9  ;;  %v354_v21 = vadd.f32 %v353_v17, %v278_v11 }
 0x15b   :  { %539 = vtanh.f32 %v348_v20 }
 0x15c   :  { %541 = vtanh.f32 %v354_v21 }
 0x15f   :  { %v359_v22 = vpop.f32.mrf.mxu2  ;;  %v365_v24 = vpop.f32.mrf.mxu3 }
 0x160   :  { %v350_v25 = vpop.f32.mrf.mxu0  ;;  %v356_v26 = vpop.f32.mrf.mxu1  ;;  %v360_v30 = vadd.f32 %v359_v22, %v288_v13  ;;  %v366_v35 = vadd.f32 %v365_v24, %v298_v19 }
 0x161   :  { %v351_v27 = vadd.f32 %v350_v25, %v273_v10  ;;  %v357_v29 = vadd.f32 %v356_v26, %v283_v12  ;;  %v540_v33 = vpop.eup %539 }
 0x162   :  { %v542_v38 = vpop.eup %541  ;;  %v427_v43 = vmul.f32 %v540_v33, %v390_v15 }
 0x163   :  { %543 = vtanh.f32 %v351_v27  ;;  %v429_v50 = vmul.f32 %v542_v38, %v400_v28 }
 0x164   :  { %545 = vtanh.f32 %v357_v29 }
 0x165   :  { %547 = vtanh.f32 %v360_v30 }
 0x167   :  { %v362_v31 = vpop.f32.mrf.mxu2  ;;  %v368_v32 = vpop.f32.mrf.mxu3 }
 0x168   :  { %v363_v37 = vadd.f32 %v362_v31, %v293_v14  ;;  %v369_v42 = vadd.f32 %v368_v32, %v303_v23 }
 0x169   :  { %v544_v40 = vpop.eup %543 }
 0x16a   :  { %549 = vtanh.f32 %v363_v37  ;;  %v428_v45 = vmul.f32 %v544_v40, %v395_v18  ;;  %v546_v48 = vpop.eup %545 }
 0x16b   :  { %551 = vtanh.f32 %v366_v35  ;;  %v548_v52 = vpop.eup %547  ;;  %v430_v46 = vmul.f32 %v546_v48, %v405_v41 }
 0x16c   :  { %v435_v51 = vadd.f32 %v428_v45, %v427_v43  ;;  %553 = vtanh.f32 %v369_v42  ;;  %v431_v56 = vmul.f32 %v548_v52, %v410_v49 }
 0x16e   :  { %v436_v53 = vadd.f32 %v435_v51, %v429_v50 }
 0x170   :  { %v550_v55 = vpop.eup %549  ;;  %v437_v57 = vadd.f32 %v436_v53, %v430_v46 }
 0x171   :  { %v552_v58 = vpop.eup %551  ;;  %v432_v60 = vmul.f32 %v550_v55, %v415_v59 }
 0x172   :  { %v438_v61 = vadd.f32 %v437_v57, %v431_v56  ;;  %v554_v47 = vpop.eup %553  ;;  %v433_v34 = vmul.f32 %v552_v58, %v420_v62 }
 0x173   :  { %v434_v36 = vmul.f32 %v554_v47, %v425_v0 }
 0x174   :  { %v439_v63 = vadd.f32 %v438_v61, %v432_v60 }
 0x176   :  { %v440_v39 = vadd.f32 %v439_v63, %v433_v34 }
 0x178   :  { %v441_v54 = vadd.f32 %v440_v39, %v434_v36 }
 0x17a   :  { %v442_v1 = vrot.slane %v441_v54, 4 }
 0x17c   :  { %v443_v44 = vadd.f32 %v442_v1, %v441_v54 }
 0x17e   :  { %v444_v2 = vrot.slane %v443_v44, 2 }
 0x180   :  { %v445_v3 = vadd.f32 %v444_v2, %v443_v44 }
 0x182   :  { %v446_v5 = vrot.slane %v445_v3, 1 }
 0x184   :  { %v447_v7 = vadd.f32 %v446_v5, %v445_v3 }
 0x186   :  { %v455_v8 = vadd.f32 %v454_v6, %v447_v7 }
 0x188   :  { %456 = vst [vmem:[#allocation3] sm:$0x1] %v455_v8 }
 0x189   :  { %467 = dma.vmem_to_hbm [thread:$0]  %s463_s28, 16, %s465_s0, [#allocation4]  }
 0x18a   :  { %579 = dma.done.wait [#allocation4], 16  }
 0x18b   :  { %580 = vsyncadd [#allocation4], 4294967280 }
 0x18c   :  { %472 = vsyncpa [#allocation4], 1 }

</bundles_post_ra>
